<compile_context>
chip_gen: v5e
topology: v5e:2x2
jax: 0.10.0
libtpu: 0.0.40
codegen_flags: <defaults>
</compile_context>

<pallas_src>
import functools

import jax
import jax.numpy as jnp
from jax import lax
from jax.experimental import pallas as pl
from jax.experimental.pallas import tpu as pltpu

_LANES = 128
_DEFAULT_TILE_BYTES = 4 * 1024 * 1024  # per-input VMEM buffer target (~4 MiB)


def _ipow(x, p):
    """x**p without jnp.power's log/exp path for integer exponents."""
    if p == 1:
        return x
    if p == 2:
        return x * x
    if isinstance(p, int) and p > 0:
        return lax.integer_pow(x, p)
    return jnp.power(x, p)


def _sublane_quantum(dtype):
    """Sublane packing quantum for a dtype (8 f32, 16 bf16/f16, 32 int8)."""
    itemsize = jnp.dtype(dtype).itemsize
    return {4: 8, 2: 16, 1: 32}.get(itemsize, 8)


def _reduce(loss, reduction):
    if reduction == "mean":
        return loss.mean()
    elif reduction == "sum":
        return loss.sum()
    elif reduction == "none":
        return loss
    else:
        raise Exception("Unexpected reduction {}".format(reduction))


def _dice_kernel(p_ref, t_ref, loss_ref, num_acc, den_acc, *,
                 smooth, p_exp, valid_rows_last):
    """One batch sample, one feature tile per step (feature axis innermost)."""
    j = pl.program_id(1)
    last = pl.num_programs(1) - 1

    @pl.when(j == 0)
    def _():
        # Accumulators are a single vreg each -> zero-init is negligible.
        num_acc[...] = jnp.zeros_like(num_acc)
        den_acc[...] = jnp.zeros_like(den_acc)

    pr = p_ref[0].astype(jnp.float32)   # (r_tile, 128)
    tg = t_ref[0].astype(jnp.float32)
    r_tile = pr.shape[0]
    c = r_tile // 8

    def _accum(keep=None):
        prod = pr * tg
        pw = _ipow(pr, p_exp) + _ipow(tg, p_exp)
        if keep is not None:
            # Mask AFTER the arithmetic so garbage rows (stale VMEM from the
            # partial last DMA) never reach the accumulators, and p <= 0
            # exponents remain correct for masked elements.
            zero = jnp.zeros_like(prod)
            prod = jnp.where(keep, prod, zero)
            pw = jnp.where(keep, pw, zero)
        # Partial tree reduce to one vreg: pure VALU vreg adds, no XLU, and
        # no full-tile accumulator load/store in the steady state.
        num_acc[...] += prod.reshape(c, 8, _LANES).sum(axis=0)
        den_acc[...] += pw.reshape(c, 8, _LANES).sum(axis=0)

    if valid_rows_last == r_tile:
        # Every feature tile is full -> no tail masking anywhere.
        _accum()
    else:
        @pl.when(j != last)
        def _():
            _accum()

        @pl.when(j == last)
        def _():
            row = lax.broadcasted_iota(jnp.int32, (r_tile, _LANES), 0)
            _accum(keep=row < valid_rows_last)

    @pl.when(j == last)
    def _():
        num = jnp.sum(jnp.sum(num_acc[...], axis=1, keepdims=True),
                      axis=0, keepdims=True)                      # (1, 1)
        den = jnp.sum(jnp.sum(den_acc[...], axis=1, keepdims=True),
                      axis=0, keepdims=True)                      # (1, 1)
        loss = 1.0 - (num + jnp.float32(smooth)) / (den + jnp.float32(smooth))
        loss_ref[...] = jnp.broadcast_to(loss, loss_ref.shape).astype(
            loss_ref.dtype)


def binary_dice_loss(predict, target, *, smooth=1.0, p=2, reduction="mean",
                     tile_bytes=_DEFAULT_TILE_BYTES):
    """Pallas implementation of BinaryDiceLoss.forward.

    predict, target: same shape [N, *] (e.g. NCHW).  Returns a scalar for
    'mean'/'sum', or a [N] vector for 'none'.
    """
    assert predict.shape[0] == target.shape[0], \
        "predict & target batch size don't match"
    n = predict.shape[0]
    pred2d = predict.reshape(n, -1)
    targ2d = target.reshape(n, -1)
    assert pred2d.shape[1] == targ2d.shape[1], \
        "predict & target flattened feature size don't match"
    d = pred2d.shape[1]

    # Stream in native float dtype (bf16 halves HBM bytes); cast bool/int once.
    def _as_streamable(x):
        if x.dtype in (jnp.float32, jnp.bfloat16, jnp.float16):
            return x
        return x.astype(jnp.float32)

    pred2d = _as_streamable(pred2d)
    targ2d = _as_streamable(targ2d)

    rows = pl.cdiv(d, _LANES)
    q = max(_sublane_quantum(pred2d.dtype), _sublane_quantum(targ2d.dtype))

    # Tiny feature dim: the whole per-sample workload is a handful of vregs;
    # pallas_call launch + per-step overhead dominates -> plain XLA is better.
    if rows < q:
        prf = pred2d.astype(jnp.float32)
        tgf = targ2d.astype(jnp.float32)
        num = jnp.sum(prf * tgf, axis=1) + smooth
        den = jnp.sum(_ipow(prf, p) + _ipow(tgf, p), axis=1) + smooth
        return _reduce(1.0 - num / den, reduction)

    # Lane padding: only when D is not a multiple of 128 (the one remaining
    # wrapper-side copy).  Row raggedness is masked inside the kernel instead.
    d_lane = rows * _LANES
    if d_lane != d:
        if not p > 0:
            raise ValueError("zero-padding requires p > 0 (got p=%r)" % (p,))
        pad_cfg = ((0, 0), (0, d_lane - d))
        pred2d = jnp.pad(pred2d, pad_cfg)
        targ2d = jnp.pad(targ2d, pad_cfg)

    pred3d = pred2d.reshape(n, rows, _LANES)
    targ3d = targ2d.reshape(n, rows, _LANES)

    # Row tile: target ~tile_bytes per input buffer, clamped to the actual row
    # count and rounded down to the sublane quantum.
    itemsize = max(pred3d.dtype.itemsize, targ3d.dtype.itemsize)
    r_tile = max(q, int(tile_bytes) // (_LANES * itemsize))
    r_tile = min(r_tile, rows)
    r_tile = max(q, (r_tile // q) * q)

    grid_j = pl.cdiv(rows, r_tile)
    valid_rows_last = rows - (grid_j - 1) * r_tile

    kernel = functools.partial(_dice_kernel, smooth=float(smooth), p_exp=p,
                               valid_rows_last=int(valid_rows_last))

    # 2 inputs x 2 pipeline buffers; raise scoped VMEM only when we actually
    # approach the v5e 16 MiB default (32 MiB is <= physical on all of
    # v5e/v6e/v7x).
    in_buf_bytes = 2 * r_tile * _LANES * (
        pred3d.dtype.itemsize + targ3d.dtype.itemsize)
    vmem_limit = (32 * 1024 * 1024) if in_buf_bytes > (12 * 1024 * 1024) else None

    out = pl.pallas_call(
        kernel,
        out_shape=jax.ShapeDtypeStruct((n, 1, _LANES), jnp.float32),
        grid_spec=pltpu.PrefetchScalarGridSpec(
            num_scalar_prefetch=0,
            grid=(n, grid_j),
            in_specs=[
                pl.BlockSpec((1, r_tile, _LANES), lambda b, j: (b, j, 0)),
                pl.BlockSpec((1, r_tile, _LANES), lambda b, j: (b, j, 0)),
            ],
            out_specs=pl.BlockSpec((1, 1, _LANES), lambda b, j: (b, 0, 0)),
            scratch_shapes=[
                pltpu.VMEM((8, _LANES), jnp.float32),
                pltpu.VMEM((8, _LANES), jnp.float32),
            ],
        ),
        compiler_params=pltpu.CompilerParams(
            dimension_semantics=("parallel", "arbitrary"),
            vmem_limit_bytes=vmem_limit),
    )(pred3d, targ3d)

    loss = out[:, 0, 0]  # per-sample dice loss, [N]
    return _reduce(loss, reduction)


def _reference(predict, target, smooth=1.0, p=2, reduction="mean"):
    """Pure-JAX reference matching the PyTorch module's formula."""
    n = predict.shape[0]
    pr = predict.reshape(n, -1).astype(jnp.float32)
    tg = target.reshape(n, -1).astype(jnp.float32)
    num = jnp.sum(pr * tg, axis=1) + smooth
    den = jnp.sum(pr ** p + tg ** p, axis=1) + smooth
    return _reduce(1.0 - num / den, reduction)


if __name__ == "__main__":
    key = jax.random.PRNGKey(0)
    k1, k2, k3, k4 = jax.random.split(key, 4)

    # Case 1: canonical small NCHW shape (D = 1024, multiple of 128 -> zero-copy).
    pred1 = jax.nn.sigmoid(jax.random.normal(k1, (2, 4, 16, 16), jnp.float32))
    targ1 = (jax.random.uniform(k2, (2, 4, 16, 16)) > 0.5).astype(jnp.float32)
    out1 = jax.block_until_ready(
        binary_dice_loss(pred1, targ1, smooth=1.0, p=2, reduction="mean"))
    ref1 = _reference(pred1, targ1, reduction="mean")
    assert jnp.allclose(out1, ref1, rtol=1e-5, atol=1e-6), (out1, ref1)

    # Case 2: rows (108) not a multiple of the row tile (104) -> exercises the
    # in-kernel ragged-tail mask and 'none' reduction.
    pred2 = jax.nn.sigmoid(jax.random.normal(k3, (2, 3, 72, 64), jnp.float32))
    targ2 = (jax.random.uniform(k4, (2, 3, 72, 64)) > 0.5).astype(jnp.float32)
    out2 = jax.block_until_ready(binary_dice_loss(pred2, targ2, reduction="none"))
    ref2 = _reference(pred2, targ2, reduction="none")
    assert jnp.allclose(out2, ref2, rtol=1e-5, atol=1e-6), (out2, ref2)

    # Case 3: D = 1020 (not a multiple of 128) -> minimal lane-pad path, bool
    # target cast in the wrapper, 'sum' reduction.
    pred3 = jax.nn.sigmoid(jax.random.normal(k1, (2, 3, 20, 17), jnp.float32))
    targ3 = jax.random.uniform(k2, (2, 3, 20, 17)) > 0.5   # bool target
    out3 = jax.block_until_ready(binary_dice_loss(pred3, targ3, reduction="sum"))
    ref3 = _reference(pred3, targ3, reduction="sum")
    assert jnp.allclose(out3, ref3, rtol=1e-5, atol=1e-6), (out3, ref3)

    # Case 4: native bf16 streaming (no wrapper upcast; sublane quantum 16).
    pred4 = jax.nn.sigmoid(
        jax.random.normal(k3, (2, 8, 64, 64), jnp.float32)).astype(jnp.bfloat16)
    targ4 = (jax.random.uniform(k4, (2, 8, 64, 64)) > 0.5).astype(jnp.bfloat16)
    out4 = jax.block_until_ready(binary_dice_loss(pred4, targ4, reduction="mean"))
    ref4 = _reference(pred4, targ4, reduction="mean")
    assert jnp.allclose(out4, ref4, rtol=1e-3, atol=1e-4), (out4, ref4)

    print("KERNEL_OK")
</pallas_src>

<mosaic_0001>
module attributes {stable_mosaic.version = 11 : i64} {
  func.func @_dice_kernel(%arg0: i32, %arg1: i32, %arg2: memref<1x8x128xf32, #tpu.memory_space<vmem>>, %arg3: memref<1x8x128xf32, #tpu.memory_space<vmem>>, %arg4: memref<1x1x128xf32, #tpu.memory_space<vmem>>, %arg5: memref<8x128xf32, #tpu.memory_space<vmem>>, %arg6: memref<8x128xf32, #tpu.memory_space<vmem>>) attributes {dimension_semantics = [#tpu.dimension_semantics<parallel>, #tpu.dimension_semantics<arbitrary>], iteration_bounds = array<i64: 2, 1>, scalar_prefetch = 0 : i64, scratch_operands = 2 : i64, tpu.core_type = #tpu.core_type<tc>, window_params = [{transform_indices = @transform_0, window_bounds = array<i64: 1, 8, 128>}, {transform_indices = @transform_1, window_bounds = array<i64: 1, 8, 128>}, {transform_indices = @transform_2, window_bounds = array<i64: 1, 1, 128>}]} {
    %c0_i32 = arith.constant 0 : i32
    %0 = arith.cmpi eq, %arg1, %c0_i32 : i32
    %1 = arith.extui %0 : i1 to i32
    %c0_i32_0 = arith.constant 0 : i32
    %2 = arith.cmpi ne, %1, %c0_i32_0 : i32
    scf.if %2 {
      %cst_17 = arith.constant 0.000000e+00 : f32
      %24 = vector.broadcast %cst_17 : f32 to vector<8x128xf32>
      %c0_18 = arith.constant 0 : index
      %c0_19 = arith.constant 0 : index
      %25 = vector.load %arg5[%c0_18, %c0_19] : memref<8x128xf32, #tpu.memory_space<vmem>>, vector<8x128xf32>
      tpu.vector_store %arg5[%c0_18, %c0_19], %24 {strides = array<i32>} : memref<8x128xf32, #tpu.memory_space<vmem>>, vector<8x128xf32>,
      %cst_20 = arith.constant 0.000000e+00 : f32
      %26 = vector.broadcast %cst_20 : f32 to vector<8x128xf32>
      %c0_21 = arith.constant 0 : index
      %c0_22 = arith.constant 0 : index
      %27 = vector.load %arg6[%c0_21, %c0_22] : memref<8x128xf32, #tpu.memory_space<vmem>>, vector<8x128xf32>
      tpu.vector_store %arg6[%c0_21, %c0_22], %26 {strides = array<i32>} : memref<8x128xf32, #tpu.memory_space<vmem>>, vector<8x128xf32>,
    } else {
    }
    %c0 = arith.constant 0 : index
    %c0_1 = arith.constant 0 : index
    %c0_2 = arith.constant 0 : index
    %3 = vector.load %arg2[%c0, %c0_1, %c0_2] : memref<1x8x128xf32, #tpu.memory_space<vmem>>, vector<1x8x128xf32>
    %4 = vector.shape_cast %3 : vector<1x8x128xf32> to vector<8x128xf32>
    %c0_3 = arith.constant 0 : index
    %c0_4 = arith.constant 0 : index
    %c0_5 = arith.constant 0 : index
    %5 = vector.load %arg3[%c0_3, %c0_4, %c0_5] : memref<1x8x128xf32, #tpu.memory_space<vmem>>, vector<1x8x128xf32>
    %6 = vector.shape_cast %5 : vector<1x8x128xf32> to vector<8x128xf32>
    %7 = arith.mulf %4, %6 : vector<8x128xf32>
    %8 = arith.mulf %4, %4 : vector<8x128xf32>
    %9 = arith.mulf %6, %6 : vector<8x128xf32>
    %10 = arith.addf %8, %9 : vector<8x128xf32>
    %c0_6 = arith.constant 0 : index
    %c0_7 = arith.constant 0 : index
    %11 = vector.load %arg5[%c0_6, %c0_7] : memref<8x128xf32, #tpu.memory_space<vmem>>, vector<8x128xf32>
    %12 = vector.shape_cast %7 : vector<8x128xf32> to vector<1x8x128xf32>
    %cst = arith.constant dense<0.000000e+00> : vector<8x128xf32>
    %13 = vector.multi_reduction <add>, %12, %cst [0] : vector<1x8x128xf32> to vector<8x128xf32>
    %14 = arith.addf %11, %13 : vector<8x128xf32>
    %c0_8 = arith.constant 0 : index
    %c0_9 = arith.constant 0 : index
    %15 = vector.load %arg5[%c0_8, %c0_9] : memref<8x128xf32, #tpu.memory_space<vmem>>, vector<8x128xf32>
    tpu.vector_store %arg5[%c0_8, %c0_9], %14 {strides = array<i32>} : memref<8x128xf32, #tpu.memory_space<vmem>>, vector<8x128xf32>,
    %c0_10 = arith.constant 0 : index
    %c0_11 = arith.constant 0 : index
    %16 = vector.load %arg6[%c0_10, %c0_11] : memref<8x128xf32, #tpu.memory_space<vmem>>, vector<8x128xf32>
    %17 = vector.shape_cast %10 : vector<8x128xf32> to vector<1x8x128xf32>
    %cst_12 = arith.constant dense<0.000000e+00> : vector<8x128xf32>
    %18 = vector.multi_reduction <add>, %17, %cst_12 [0] : vector<1x8x128xf32> to vector<8x128xf32>
    %19 = arith.addf %16, %18 : vector<8x128xf32>
    %c0_13 = arith.constant 0 : index
    %c0_14 = arith.constant 0 : index
    %20 = vector.load %arg6[%c0_13, %c0_14] : memref<8x128xf32, #tpu.memory_space<vmem>>, vector<8x128xf32>
    tpu.vector_store %arg6[%c0_13, %c0_14], %19 {strides = array<i32>} : memref<8x128xf32, #tpu.memory_space<vmem>>, vector<8x128xf32>,
    %c0_i32_15 = arith.constant 0 : i32
    %21 = arith.cmpi eq, %arg1, %c0_i32_15 : i32
    %22 = arith.extui %21 : i1 to i32
    %c0_i32_16 = arith.constant 0 : i32
    %23 = arith.cmpi ne, %22, %c0_i32_16 : i32
    scf.if %23 {
      %c0_17 = arith.constant 0 : index
      %c0_18 = arith.constant 0 : index
      %24 = vector.load %arg5[%c0_17, %c0_18] : memref<8x128xf32, #tpu.memory_space<vmem>>, vector<8x128xf32>
      %cst_19 = arith.constant dense<0.000000e+00> : vector<8xf32>
      %25 = vector.multi_reduction <add>, %24, %cst_19 [1] : vector<8x128xf32> to vector<8xf32>
      %26 = vector.shape_cast %25 : vector<8xf32> to vector<8x1xf32>
      %cst_20 = arith.constant dense<0.000000e+00> : vector<1xf32>
      %27 = vector.multi_reduction <add>, %26, %cst_20 [0] : vector<8x1xf32> to vector<1xf32>
      %28 = vector.shape_cast %27 : vector<1xf32> to vector<1x1xf32>
      %c0_21 = arith.constant 0 : index
      %c0_22 = arith.constant 0 : index
      %29 = vector.load %arg6[%c0_21, %c0_22] : memref<8x128xf32, #tpu.memory_space<vmem>>, vector<8x128xf32>
      %cst_23 = arith.constant dense<0.000000e+00> : vector<8xf32>
      %30 = vector.multi_reduction <add>, %29, %cst_23 [1] : vector<8x128xf32> to vector<8xf32>
      %31 = vector.shape_cast %30 : vector<8xf32> to vector<8x1xf32>
      %cst_24 = arith.constant dense<0.000000e+00> : vector<1xf32>
      %32 = vector.multi_reduction <add>, %31, %cst_24 [0] : vector<8x1xf32> to vector<1xf32>
      %33 = vector.shape_cast %32 : vector<1xf32> to vector<1x1xf32>
      %cst_25 = arith.constant 1.000000e+00 : f32
      %34 = vector.broadcast %cst_25 : f32 to vector<1x1xf32>
      %35 = arith.addf %28, %34 : vector<1x1xf32>
      %cst_26 = arith.constant 1.000000e+00 : f32
      %36 = vector.broadcast %cst_26 : f32 to vector<1x1xf32>
      %37 = arith.addf %33, %36 : vector<1x1xf32>
      %38 = arith.divf %35, %37 : vector<1x1xf32>
      %cst_27 = arith.constant 1.000000e+00 : f32
      %39 = vector.broadcast %cst_27 : f32 to vector<1x1xf32>
      %40 = arith.subf %39, %38 : vector<1x1xf32>
      %41 = vector.shape_cast %40 : vector<1x1xf32> to vector<1x1x1xf32>
      %42 = vector.broadcast %41 : vector<1x1x1xf32> to vector<1x1x128xf32>
      %c0_28 = arith.constant 0 : index
      %c0_29 = arith.constant 0 : index
      %c0_30 = arith.constant 0 : index
      %43 = vector.load %arg4[%c0_28, %c0_29, %c0_30] : memref<1x1x128xf32, #tpu.memory_space<vmem>>, vector<1x1x128xf32>
      tpu.vector_store %arg4[%c0_28, %c0_29, %c0_30], %42 {strides = array<i32>} : memref<1x1x128xf32, #tpu.memory_space<vmem>>, vector<1x1x128xf32>,
    } else {
    }
    return
  }
  func.func @transform_0(%arg0: i32, %arg1: i32) -> (i32, i32, i32) {
    %c0_i32 = arith.constant 0 : i32
    %c0_i32_0 = arith.constant 0 : i32
    return %arg0, %arg1, %c0_i32 : i32, i32, i32
  }
  func.func @transform_1(%arg0: i32, %arg1: i32) -> (i32, i32, i32) {
    %c0_i32 = arith.constant 0 : i32
    %c0_i32_0 = arith.constant 0 : i32
    return %arg0, %arg1, %c0_i32 : i32, i32, i32
  }
  func.func @transform_2(%arg0: i32, %arg1: i32) -> (i32, i32, i32) {
    %c0_i32 = arith.constant 0 : i32
    %c0_i32_0 = arith.constant 0 : i32
    %c0_i32_1 = arith.constant 0 : i32
    return %arg0, %c0_i32, %c0_i32_0 : i32, i32, i32
  }
}

</mosaic_0001>

<bundles_post_ra>
// kernel: tpu_custom_call.1
= control target key start
LH: loop header
LB: loop body
LE: loop exit
PB: predicated region body
PF: predicated region fallthrough
CT: control target
= control target key end

     0   :  { %7 = vsyncpa [#allocation5], 0  ;;  %s763_s0 = inlined_call_operand.hbm [shape: f32[2,8,128], index: 0, kind: input, shape index: {}]   ;;  %s764_s1 = inlined_call_operand.hbm [shape: f32[2,8,128], index: 1, kind: input, shape index: {}]   ;;  %s765_s2 = inlined_call_operand.hbm [shape: f32[2,1,128], index: 2, kind: output, shape index: {}]  }
   0x1   :  { %9 = vsyncpa [#allocation5 + $0x1], 0 }
   0x2   :  { %10 = vsyncpa [#allocation8], 0 }
   0x3   :  { %12 = vsyncpa [#allocation8 + $0x1], 0 }
   0x4   :  { %13 = vsyncpa [#allocation6], 0 }
   0x5   :  { %15 = vsyncpa [#allocation6 + $0x1], 0  ;;  %s634_s9 = smov 0   ;;  %s636_s10 = smov 0  }
   0x6   :  { %s638_s11 = smov 0   ;;  %s640_s12 = smov 0  }
   0x7   :  { %s642_s13 = smov 0   ;;  %s644_s14 = smov 0  }
   0x8 LB: > { %s389_s15 = sadd.s32 4294967295, %s617_s14   ;;  %s390_s16 = sadd.s32 4294967294, %s617_s14   ;;  %s617_s14 = sphi %s644_s14, %s21_s14   ;;  %s613_s13 = sphi %s642_s13, %s774_s13   ;;  %s609_s12 = sphi %s640_s12, %s773_s12   ;;  %s605_s11 = sphi %s638_s11, %s772_s11   ;;  %s601_s10 = sphi %s636_s10, %s771_s10   ;;  %s597_s9 = sphi %s634_s9, %s770_s9  }
   0x9   : > { %s33_s17 = sadd.s32 1, %s613_s13  ;;  %s42_s18 = sadd.s32 1, %s605_s11 }
   0xa   : > { %p35_p0 = scmp.ge.s32.totalorder %s33_s17, 2  ;;  %p49_p1 = scmp.ne.s32.totalorder %s605_s11, %s601_s10 }
   0xb   : > { %p50_p2 = scmp.eq.s32.totalorder %s617_s14, 0  ;;  %p55_p3 = scmp.ne.s32.totalorder %s601_s10, %s597_s9 }
   0xc   : > { %s776_s17 = smov (%p35_p0, %s33_s17), 0  ;;  %p56_p5 = scmp.eq.s32.totalorder %s389_s15, 0 }
   0xd   : > { %p675_p4 = por %p50_p2, %p49_p1  ;;  %s37_s20 = ssub.s32 %s613_s13, %s776_s17 }
   0xe   : > { %p107_p6 = scmp.eq.s32.totalorder %s389_s15, 1  ;;  %p40_p7 = scmp.eq.s32.totalorder %s37_s20, 0 }
   0xf   : > { %p681_p8 = por %p56_p5, %p55_p3  ;;  %p113_p10 = scmp.eq.s32.totalorder %s390_s16, 1 }
  0x10   : > { %p685_p9 = por %p107_p6, %p49_p1  ;;  %p392_p12 = scmp.ge.s32.totalorder %s617_s14, 2 }
  0x11   : > { %s690_s23 = scalar_select %p40_p7, %s605_s11, %s42_s18  }
  0x12   : > { %p692_p11 = por %p113_p10, %p55_p3  ;;  %p419_p13 = scmp.lt.s32.totalorder %s617_s14, 2 }
  0x13   : > { %s133_s25 = sand.u32 1, %s605_s11   ;;  %s394_s27 = sshll.u32 %s613_s13, 3 }
  0x14   : > { %s393_s26 = sshll.u32 %s133_s25, 3  ;;  %s142_s30 = scalar_lea.hbm %s763_s0, %s394_s27 }
  0x15   : > { %s137_s3 = scalar_lea.vmem [#allocation4], %s393_s26  ;;  %s144_s5 = sshll.u32 %s142_s30, 4  ;;  %s145_s5 = int_to_ptr.hbm [resolvable:$true] %s144_s5 }
  0x16   : > { %s146_s4 = sshll.u32 %s137_s3, 4  ;;  %p409_p0 = pnand %p419_p13, %p675_p4  ;;  %s147_s4 = int_to_ptr.vmem [resolvable:$true] %s146_s4 }
  0x17   : > { %p397_p1 = scmp.ge.s32.totalorder %s617_s14, 1  ;;  %p171_p2 = scmp.lt.s32.totalorder %s617_s14, 3 }
  0x18   : > { %s134_s6 = scalar_lea.sflag [#allocation5], %s133_s25  ;;  %s162_s15 = scalar_lea.hbm %s764_s1, %s394_s27 }
  0x19   : > { %411 = dma.hbm_to_vmem [thread:$0]  (!%p409_p0), %s145_s5, 128, %s147_s4, %s134_s6  }
  0x1a   : > { %p172_p3 = pnand %p397_p1, %p171_p2  ;;  %s157_s16 = scalar_lea.vmem [#allocation7], %s393_s26 }
  0x1b   : > { %s166_s18 = sshll.u32 %s157_s16, 4  ;;  %s164_s20 = sshll.u32 %s162_s15, 4  ;;  %s167_s18 = int_to_ptr.vmem [resolvable:$true] %s166_s18  ;;  %s165_s20 = int_to_ptr.hbm [resolvable:$true] %s164_s20 }
  0x1c   : > { %s154_s28 = scalar_lea.sflag [#allocation8], %s133_s25  ;;  %175 = sbr.rel (%p172_p3) target bundleno = 195 (0xc3), region = 28 }
  0x1d   : > { %414 = dma.hbm_to_vmem [thread:$0]  (!%p409_p0), %s165_s20, 128, %s167_s18, %s154_s28  }
  0x1e   : > { %s711_s19 = sand.u32 (!%p172_p3), 1, %s601_s10  }
  0x1f   : > { %s398_s29 = sshll.u32 (!%p172_p3), %s711_s19, 3  ;;  %s178_s30 = scalar_lea.sflag (!%p172_p3), [#allocation5], %s711_s19 }
  0x20   : > { %s181_s3 = scalar_lea.vmem (!%p172_p3), [#allocation4], %s398_s29 }
  0x21   : > { %584 = dma.done.wait (%p681_p8), %s178_s30, 128  }
  0x22   : > { %586 = vsyncadd (%p681_p8), %s178_s30, 4294967168  ;;  %s188_s26 = scalar_lea.sflag [#allocation8], %s711_s19  ;;  %s191_s25 = scalar_lea.vmem [#allocation7], %s398_s29 }
  0x23   : > { %588 = dma.done.wait (%p681_p8), %s188_s26, 128  }
  0x24   : > { %590 = vsyncadd (%p681_p8), %s188_s26, 4294967168  ;;  %v223_v0 = vld [vmem:[%s181_s3] sm:$0xff]  ;;  %v224_v1 = vld [vmem:[%s191_s25] sm:$0xff]  ;;  %s286_s4 = scalar_lea.hbm %s765_s2, %s609_s12  ;;  %s216_s5 = scalar_lea.vmem [#allocation9], %s711_s19 }
  0x25   : > { %v226_v2 = vmul.f32 %v223_v0, %v223_v0  ;;  %v227_v3 = vmul.f32 %v224_v1, %v224_v1  ;;  %v225_v5 = vmul.f32 %v224_v1, %v223_v0  ;;  %s288_s6 = sshll.u32 %s216_s5, 4  ;;  %s290_s7 = sshll.u32 %s286_s4, 4  ;;  %s289_s6 = int_to_ptr.vmem [resolvable:$true] %s288_s6  ;;  %s291_s7 = int_to_ptr.hbm [resolvable:$true] %s290_s7 }
  0x26   : > { %s278_s8 = scalar_lea.sflag [#allocation6], %s711_s19  ;;  %s545_s15 = sshra.s32 %s291_s7, 4  ;;  %s546_s15 = int_to_ptr.hbm [resolvable:$true] %s545_s15 }
  0x27   : > { %v228_v4 = vadd.f32 %v227_v3, %v226_v2  ;;  %s547_s16 = scalar_lea.hbm %s546_s15, 1  ;;  %s551_s20 = scalar_lea.hbm %s765_s2, 2 }
  0x28   : > { %p548_p4 = scmp.ne.s32.totalorder %s546_s15, %s547_s16  ;;  %p552_p7 = scmp.lt.s32.totalorder %s546_s15, %s765_s2 }
  0x29   : > { %250 = vadd.xlane.f32.xlu0 %v228_v4  ;;  %p553_p8 = scmp.lt.s32.totalorder %s551_s20, %s547_s16 }
  0x2a   : > { %p549_p5 = pnand %p548_p4, %p685_p9 }
  0x2b   : > { %p554_p10 = por %p553_p8, %p552_p7 }
  0x2c   : > { %p550_p6 = pneg %p549_p5 }
  0x2e   : > { %p555_p13 = pnand %p554_p10, %p550_p6 }
  0x31   : > { %241 = vadd.xlane.f32.xlu0 %v225_v5 }
  0x9c   : > { %v251_v6 = vpop.xlane.xlu0 %250 }
  0x9d   : > { %v252_v7 = vrot.slane %v251_v6, 4 }
  0x9f   : > { %v253_v8 = vadd.f32 %v252_v7, %v251_v6 }
  0xa1   : > { %v254_v9 = vrot.slane %v253_v8, 2 }
  0xa3   : > { %v255_v10 = vadd.f32 %v254_v9, %v253_v8 }
  0xa4   : > { %v242_v11 = vpop.xlane.xlu0 %241 }
  0xa5   : > { %v256_v12 = vrot.slane %v255_v10, 1  ;;  %v243_v13 = vrot.slane %v242_v11, 4 }
  0xa7   : > { %v257_v14 = vadd.f32 %v256_v12, %v255_v10  ;;  %v244_v15 = vadd.f32 %v243_v13, %v242_v11 }
  0xa9   : > { %v259_v16 = vadd.f32 1.0, %v257_v14  ;;  %v245_v17 = vrot.slane %v244_v15, 2 }
  0xab   : > { %469 = vrcp.f32 %v259_v16  ;;  %v246_v18 = vadd.f32 %v245_v17, %v244_v15  ;;  %v271_v23 = vand.u32 2147483648, %v259_v16  ;;  %v269_v25 = vand.u32 2147483647, %v259_v16 }
  0xac   : > { %vm265_vm1 = vweird.f32 %v259_v16 }
  0xad   : > { %v247_v21 = vrot.slane %v246_v18, 1  ;;  %v272_v28 = vor.u32 1.1754944e-38, %v271_v23  ;;  %vm270_vm3 = vcmp.eq.f32.partialorder %v269_v25, 8.507059e+37 }
  0xaf   : > { %v248_v26 = vadd.f32 %v247_v21, %v246_v18 }
  0xb1   : > { %v470_v19 = vpop.eup %469  ;;  %v258_v30 = vadd.f32 1.0, %v248_v26 }
  0xb2   : > { %v261_v20 = vmul.f32 %v470_v19, %v259_v16  ;;  %vm266_vm0 = vweird.f32 %v470_v19 }
  0xb3   : > { %vm267_vm2 = vmor %vm265_vm1, %vm266_vm0 }
  0xb4   : > { %v262_v22 = vsub.f32 1.0, %v261_v20 }
  0xb6   : > { %v263_v24 = vmul.f32 %v470_v19, %v262_v22 }
  0xb8   : > { %v264_v27 = vadd.f32 %v470_v19, %v263_v24 }
  0xba   : > { %v268_v29 = vsel %vm267_vm2, %v470_v19, %v264_v27 }
  0xbb   : > { %v273_v31 = vsel %vm270_vm3, %v272_v28, %v268_v29 }
  0xbc   : > { %v274_v32 = vmul.f32 %v273_v31, %v258_v30 }
  0xbe   : > { %v275_v33 = vsub.f32 1.0, %v274_v32 }
  0xc0   : > { %276 = vst [vmem:[%s216_s5] sm:$0x1] %v275_v33 }
  0xc1   : > { %558 = shalt.err (!%p555_p13)
}
  0xc2   : > { %406 = dma.vmem_to_hbm [thread:$0]  (%p685_p9), %s289_s6, 16, %s291_s7, %s278_s8  }
  0xc3 PF: > { %s302_s19 = sand.u32 1, %s597_s9   ;;  %p416_p0 = pnand %p392_p12, %p692_p11 }
  0xc4   : > { %s303_s30 = scalar_lea.sflag [#allocation6], %s302_s19 }
  0xc5   : > { %p417_p1 = pneg %p416_p0 }
  0xc7   : > { %592 = dma.done.wait (%p417_p1), %s303_s30, 16  }
  0xc8   : > { %594 = vsyncadd (%p417_p1), %s303_s30, 4294967280  ;;  %s21_s14 = sadd.s32 1, %s617_s14   ;;  %s770_s9 = smov %s601_s10 }
  0xc9   : > { %p18_p2 = scmp.ge.s32.totalorder %s21_s14, 4   ;;  %s771_s10 = smov %s605_s11 }
  0xca   : > { %s772_s11 = smov %s690_s23  ;;  %s773_s12 = smov %s613_s13 }
  0xcb   : > { %s774_s13 = smov %s776_s17  ;;  %20 = sbr.rel (!%p18_p2) target bundleno = 8 (0x8), region = 94 }
  0xd0   :  { %308 = vsyncpa [#allocation5], 1 }
  0xd1   :  { %310 = vsyncpa [#allocation5 + $0x1], 1 }
  0xd2   :  { %311 = vsyncpa [#allocation8], 1 }
  0xd3   :  { %313 = vsyncpa [#allocation8 + $0x1], 1 }
  0xd4   :  { %314 = vsyncpa [#allocation6], 1 }
  0xd5   :  { %316 = vsyncpa [#allocation6 + $0x1], 1 }

</bundles_post_ra>
